<compile_context>
chip_gen: v7x
topology: tpu7x:2x2x1
jax: 0.10.0
libtpu: 0.0.40
codegen_flags: <defaults>
</compile_context>

<pallas_src>
import functools
import numpy as np
import jax
import jax.numpy as jnp
from jax.experimental import pallas as pl
from jax.experimental.pallas import tpu as pltpu

LANE = 128
SUB = 8
ALIGN = SUB * LANE                  # 1024 elements = one (8,128) f32 vreg
BLOCK_ROWS_TARGET = 8192            # 4 MiB per f32 DMA tile (16384 also viable on v7x)
CHUNK_ROWS = 256                    # inner fold granularity (~128 KiB f32 temps)
NCORES = 2                          # leading "parallel" axis; ~2x on v7x, harmless on 1-TC chips
VMEM_LIMIT_BYTES = 32 * 1024 * 1024


def _dice_kernel(pr_ref, gt_ref, tp_ref, s_ref, *,
                 total, block_rows, chunk_rows, nblocks, steps_per_core, mask_tail):
    p = pl.program_id(0)            # core index (parallel axis)
    i = pl.program_id(1)            # per-core block step (arbitrary / reduction axis)
    blk = p * steps_per_core + i    # global block index (row scale -> no int32 overflow)

    # (Re)initialize this core's resident output accumulators on its first step.
    @pl.when(i == 0)
    def _init():
        tp_ref[...] = jnp.zeros_like(tp_ref)
        s_ref[...] = jnp.zeros_like(s_ref)

    full_rows = total // LANE       # rows that are entirely valid (static)
    rem_lanes = total % LANE        # valid lanes in the single partial row (static)

    def fold(prob, gt, nrows):
        nf = nrows // SUB
        tp_ref[...] += (gt * prob).reshape(nf, SUB, LANE).sum(axis=0)
        s_ref[...] += (prob + gt).reshape(nf, SUB, LANE).sum(axis=0)

    def accumulate(masked):
        base_row = blk * block_rows

        def one_chunk(row0, nrows, row_iota, lane_iota):
            pr = pr_ref[pl.ds(row0, nrows), :].astype(jnp.float32)
            gt = gt_ref[pl.ds(row0, nrows), :].astype(jnp.float32)
            prob = 0.5 * (1.0 + jnp.tanh(0.5 * pr))      # sigmoid, single EUP op
            if masked:
                grow = base_row + row0 + row_iota         # global row index
                valid = (grow < full_rows) | ((grow == full_rows) & (lane_iota < rem_lanes))
                prob = jnp.where(valid, prob, 0.0)
                gt = jnp.where(valid, gt, 0.0)
            fold(prob, gt, nrows)

        def iotas(nrows):
            if not masked:
                return None, None
            return (jax.lax.broadcasted_iota(jnp.int32, (nrows, LANE), 0),
                    jax.lax.broadcasted_iota(jnp.int32, (nrows, LANE), 1))

        n_full = block_rows // chunk_rows
        rem_rows = block_rows % chunk_rows                # multiple of 8 (possibly 0)

        if n_full == 1 and rem_rows == 0:
            # Single-chunk block: static offset, no loop.
            r_iota, l_iota = iotas(block_rows)
            one_chunk(0, block_rows, r_iota, l_iota)
        else:
            if n_full > 0:
                r_iota, l_iota = iotas(chunk_rows)        # hoisted out of the loop
                def body(c, carry):
                    row0 = pl.multiple_of(c * chunk_rows, chunk_rows)
                    one_chunk(row0, chunk_rows, r_iota, l_iota)
                    return carry
                jax.lax.fori_loop(0, n_full, body, 0)
            if rem_rows > 0:
                r_iota, l_iota = iotas(rem_rows)
                one_chunk(n_full * chunk_rows, rem_rows, r_iota, l_iota)

    active = blk < nblocks          # inactive steps (odd nblocks) just re-read the last block
    if mask_tail:
        is_last = blk == nblocks - 1
        @pl.when(jnp.logical_and(active, jnp.logical_not(is_last)))
        def _bulk():
            accumulate(False)
        @pl.when(is_last)           # is_last implies active
        def _tail():
            accumulate(True)
    else:
        @pl.when(active)
        def _bulk():
            accumulate(False)


def dice_loss(y_pr, y_gt, eps=1e-7):
    """Pallas TPU implementation of DiceLoss(activation='sigmoid').forward."""
    assert y_pr.shape == y_gt.shape
    total = int(np.prod(y_pr.shape))
    assert total > 0

    pr_flat = y_pr.reshape(-1)
    gt_flat = y_gt.reshape(-1)

    if total % ALIGN == 0:
        rows = total // LANE                         # zero-copy: pure reshape
    else:
        # TODO(synk): zero-copy tail handling would avoid this full-array pad (rare path).
        padded = -(-total // ALIGN) * ALIGN          # pad to next (8,128) boundary only
        pr_flat = jnp.pad(pr_flat, (0, padded - total))
        gt_flat = jnp.pad(gt_flat, (0, padded - total))
        rows = padded // LANE

    pr2 = pr_flat.reshape(rows, LANE)                # native dtype; cast happens in-kernel
    gt2 = gt_flat.reshape(rows, LANE)

    block_rows = rows if rows <= BLOCK_ROWS_TARGET else BLOCK_ROWS_TARGET
    chunk_rows = min(block_rows, CHUNK_ROWS)
    nblocks = -(-rows // block_rows)
    steps_per_core = -(-nblocks // NCORES)
    # Mask only if the last block reaches past the valid elements (host pad lanes and/or the
    # unspecified values Pallas supplies for a ragged final block).
    mask_tail = (nblocks * block_rows * LANE != total)

    def in_idx(p, i):   # clamp so inactive steps stay within the array
        return (jnp.minimum(p * steps_per_core + i, nblocks - 1), 0)

    out_idx = lambda p, i: (p, 0, 0)

    kernel = functools.partial(
        _dice_kernel, total=total, block_rows=block_rows, chunk_rows=chunk_rows,
        nblocks=nblocks, steps_per_core=steps_per_core, mask_tail=mask_tail)

    tp_parts, s_parts = pl.pallas_call(
        kernel,
        out_shape=(jax.ShapeDtypeStruct((NCORES, SUB, LANE), jnp.float32),
                   jax.ShapeDtypeStruct((NCORES, SUB, LANE), jnp.float32)),
        grid_spec=pltpu.PrefetchScalarGridSpec(
            num_scalar_prefetch=0,
            grid=(NCORES, steps_per_core),
            in_specs=[pl.BlockSpec((block_rows, LANE), in_idx),
                      pl.BlockSpec((block_rows, LANE), in_idx)],
            out_specs=(pl.BlockSpec((None, SUB, LANE), out_idx),
                       pl.BlockSpec((None, SUB, LANE), out_idx)),
        ),
        compiler_params=pltpu.CompilerParams(
            dimension_semantics=("parallel", "arbitrary"),
            vmem_limit_bytes=VMEM_LIMIT_BYTES,
        ),
    )(pr2, gt2)

    tp = jnp.sum(tp_parts)
    s = jnp.sum(s_parts)            # = sum(p) + sum(gt) = 2*tp + fp + fn
    score = (2.0 * tp + eps) / (s + eps)
    return 1.0 - score


def _dice_loss_ref(y_pr, y_gt, eps=1e-7):
    p = jax.nn.sigmoid(y_pr.astype(jnp.float32))
    gt = y_gt.astype(jnp.float32)
    tp = jnp.sum(gt * p)
    fp = jnp.sum(p) - tp
    fn = jnp.sum(gt) - tp
    score = (2.0 * tp + eps) / (2.0 * tp + fn + fp + eps)
    return 1.0 - score


def _check(name, y_pr, y_gt):
    got = np.asarray(jax.block_until_ready(dice_loss(y_pr, y_gt)))
    want = np.asarray(jax.block_until_ready(_dice_loss_ref(y_pr, y_gt)))
    assert np.allclose(got, want, rtol=1e-5, atol=1e-5), (name, got, want)


if __name__ == "__main__":
    key = jax.random.PRNGKey(0)
    k = jax.random.split(key, 8)

    # 1) NCHW segmentation logits, aligned fast path (no pad, no mask).
    y_pr = jax.random.normal(k[0], (2, 4, 16, 16), dtype=jnp.float32)
    y_gt = (jax.random.uniform(k[1], (2, 4, 16, 16)) > 0.5).astype(jnp.float32)
    _check("aligned_f32", y_pr, y_gt)

    # 2) Ragged element count -> small pad + last-block masking path.
    y_pr2 = jax.random.normal(k[2], (2, 3, 15, 17), dtype=jnp.float32)
    y_gt2 = (jax.random.uniform(k[3], (2, 3, 15, 17)) > 0.5).astype(jnp.float32)
    _check("ragged_f32", y_pr2, y_gt2)

    # 3) Narrow-dtype caller contract (bf16 logits + int8 mask): 3 B/element of HBM traffic.
    y_pr3 = jax.random.normal(k[4], (2, 4, 32, 16), dtype=jnp.float32).astype(jnp.bfloat16)
    y_gt3 = (jax.random.uniform(k[5], (2, 4, 32, 16)) > 0.5).astype(jnp.int8)
    _check("narrow_dtype", y_pr3, y_gt3)

    # 4) Multi-block case: exercises the 2-core split, chunked fold loop, and the zero-copy
    #    ragged-last-block masking (1310720 % 1024 == 0 -> no host pad).
    y_pr4 = jax.random.normal(k[6], (2, 4, 512, 320), dtype=jnp.float32)
    y_gt4 = (jax.random.uniform(k[7], (2, 4, 512, 320)) > 0.5).astype(jnp.float32)
    _check("multiblock_f32", y_pr4, y_gt4)

    print("KERNEL_OK")
</pallas_src>

<mosaic_0001>
module attributes {stable_mosaic.version = 11 : i64} {
  func.func @_dice_kernel(%arg0: i32, %arg1: i32, %arg2: memref<16x128xf32, #tpu.memory_space<vmem>>, %arg3: memref<16x128xf32, #tpu.memory_space<vmem>>, %arg4: memref<1x8x128xf32, #tpu.memory_space<vmem>>, %arg5: memref<1x8x128xf32, #tpu.memory_space<vmem>>) attributes {dimension_semantics = [#tpu.dimension_semantics<parallel>, #tpu.dimension_semantics<arbitrary>], iteration_bounds = array<i64: 2, 1>, scalar_prefetch = 0 : i64, scratch_operands = 0 : i64, tpu.core_type = #tpu.core_type<tc>, window_params = [{transform_indices = @transform_0, window_bounds = array<i64: 16, 128>}, {transform_indices = @transform_1, window_bounds = array<i64: 16, 128>}, {transform_indices = @transform_2, window_bounds = array<i64: 1, 8, 128>}, {transform_indices = @transform_3, window_bounds = array<i64: 1, 8, 128>}]} {
    %c1_i32 = arith.constant 1 : i32
    %0 = arith.muli %arg0, %c1_i32 : i32
    %1 = arith.addi %0, %arg1 : i32
    %c0_i32 = arith.constant 0 : i32
    %2 = arith.cmpi eq, %arg1, %c0_i32 : i32
    %3 = arith.extui %2 : i1 to i32
    %c0_i32_0 = arith.constant 0 : i32
    %4 = arith.cmpi ne, %3, %c0_i32_0 : i32
    scf.if %4 {
      %cst = arith.constant 0.000000e+00 : f32
      %8 = vector.broadcast %cst : f32 to vector<8x128xf32>
      %c0 = arith.constant 0 : index
      %c0_3 = arith.constant 0 : index
      %c0_4 = arith.constant 0 : index
      %9 = vector.load %arg4[%c0, %c0_3, %c0_4] : memref<1x8x128xf32, #tpu.memory_space<vmem>>, vector<1x8x128xf32>
      %10 = vector.shape_cast %9 : vector<1x8x128xf32> to vector<8x128xf32>
      %11 = vector.shape_cast %8 : vector<8x128xf32> to vector<1x8x128xf32>
      tpu.vector_store %arg4[%c0, %c0_3, %c0_4], %11 {strides = array<i32>} : memref<1x8x128xf32, #tpu.memory_space<vmem>>, vector<1x8x128xf32>,
      %cst_5 = arith.constant 0.000000e+00 : f32
      %12 = vector.broadcast %cst_5 : f32 to vector<8x128xf32>
      %c0_6 = arith.constant 0 : index
      %c0_7 = arith.constant 0 : index
      %c0_8 = arith.constant 0 : index
      %13 = vector.load %arg5[%c0_6, %c0_7, %c0_8] : memref<1x8x128xf32, #tpu.memory_space<vmem>>, vector<1x8x128xf32>
      %14 = vector.shape_cast %13 : vector<1x8x128xf32> to vector<8x128xf32>
      %15 = vector.shape_cast %12 : vector<8x128xf32> to vector<1x8x128xf32>
      tpu.vector_store %arg5[%c0_6, %c0_7, %c0_8], %15 {strides = array<i32>} : memref<1x8x128xf32, #tpu.memory_space<vmem>>, vector<1x8x128xf32>,
    } else {
    }
    %c1_i32_1 = arith.constant 1 : i32
    %5 = arith.cmpi slt, %1, %c1_i32_1 : i32
    %6 = arith.extui %5 : i1 to i32
    %c0_i32_2 = arith.constant 0 : i32
    %7 = arith.cmpi ne, %6, %c0_i32_2 : i32
    scf.if %7 {
      %c0 = arith.constant 0 : index
      %c0_3 = arith.constant 0 : index
      %8 = vector.load %arg2[%c0, %c0_3] : memref<16x128xf32, #tpu.memory_space<vmem>>, vector<16x128xf32>
      %c0_4 = arith.constant 0 : index
      %c0_5 = arith.constant 0 : index
      %9 = vector.load %arg3[%c0_4, %c0_5] : memref<16x128xf32, #tpu.memory_space<vmem>>, vector<16x128xf32>
      %cst = arith.constant 5.000000e-01 : f32
      %10 = vector.broadcast %cst : f32 to vector<16x128xf32>
      %11 = arith.mulf %10, %8 : vector<16x128xf32>
      %12 = math.tanh %11 : vector<16x128xf32>
      %cst_6 = arith.constant 1.000000e+00 : f32
      %13 = vector.broadcast %cst_6 : f32 to vector<16x128xf32>
      %14 = arith.addf %13, %12 : vector<16x128xf32>
      %cst_7 = arith.constant 5.000000e-01 : f32
      %15 = vector.broadcast %cst_7 : f32 to vector<16x128xf32>
      %16 = arith.mulf %15, %14 : vector<16x128xf32>
      %c0_8 = arith.constant 0 : index
      %c0_9 = arith.constant 0 : index
      %c0_10 = arith.constant 0 : index
      %17 = vector.load %arg4[%c0_8, %c0_9, %c0_10] : memref<1x8x128xf32, #tpu.memory_space<vmem>>, vector<1x8x128xf32>
      %18 = vector.shape_cast %17 : vector<1x8x128xf32> to vector<8x128xf32>
      %19 = arith.mulf %9, %16 : vector<16x128xf32>
      %20 = vector.shape_cast %19 : vector<16x128xf32> to vector<2x8x128xf32>
      %cst_11 = arith.constant dense<0.000000e+00> : vector<8x128xf32>
      %21 = vector.multi_reduction <add>, %20, %cst_11 [0] : vector<2x8x128xf32> to vector<8x128xf32>
      %22 = arith.addf %18, %21 : vector<8x128xf32>
      %c0_12 = arith.constant 0 : index
      %c0_13 = arith.constant 0 : index
      %c0_14 = arith.constant 0 : index
      %23 = vector.load %arg4[%c0_12, %c0_13, %c0_14] : memref<1x8x128xf32, #tpu.memory_space<vmem>>, vector<1x8x128xf32>
      %24 = vector.shape_cast %23 : vector<1x8x128xf32> to vector<8x128xf32>
      %25 = vector.shape_cast %22 : vector<8x128xf32> to vector<1x8x128xf32>
      tpu.vector_store %arg4[%c0_12, %c0_13, %c0_14], %25 {strides = array<i32>} : memref<1x8x128xf32, #tpu.memory_space<vmem>>, vector<1x8x128xf32>,
      %c0_15 = arith.constant 0 : index
      %c0_16 = arith.constant 0 : index
      %c0_17 = arith.constant 0 : index
      %26 = vector.load %arg5[%c0_15, %c0_16, %c0_17] : memref<1x8x128xf32, #tpu.memory_space<vmem>>, vector<1x8x128xf32>
      %27 = vector.shape_cast %26 : vector<1x8x128xf32> to vector<8x128xf32>
      %28 = arith.addf %16, %9 : vector<16x128xf32>
      %29 = vector.shape_cast %28 : vector<16x128xf32> to vector<2x8x128xf32>
      %cst_18 = arith.constant dense<0.000000e+00> : vector<8x128xf32>
      %30 = vector.multi_reduction <add>, %29, %cst_18 [0] : vector<2x8x128xf32> to vector<8x128xf32>
      %31 = arith.addf %27, %30 : vector<8x128xf32>
      %c0_19 = arith.constant 0 : index
      %c0_20 = arith.constant 0 : index
      %c0_21 = arith.constant 0 : index
      %32 = vector.load %arg5[%c0_19, %c0_20, %c0_21] : memref<1x8x128xf32, #tpu.memory_space<vmem>>, vector<1x8x128xf32>
      %33 = vector.shape_cast %32 : vector<1x8x128xf32> to vector<8x128xf32>
      %34 = vector.shape_cast %31 : vector<8x128xf32> to vector<1x8x128xf32>
      tpu.vector_store %arg5[%c0_19, %c0_20, %c0_21], %34 {strides = array<i32>} : memref<1x8x128xf32, #tpu.memory_space<vmem>>, vector<1x8x128xf32>,
    } else {
    }
    return
  }
  func.func @transform_0(%arg0: i32, %arg1: i32) -> (i32, i32) {
    %c1_i32 = arith.constant 1 : i32
    %0 = arith.muli %arg0, %c1_i32 : i32
    %1 = arith.addi %0, %arg1 : i32
    %c0_i32 = arith.constant 0 : i32
    %2 = arith.minsi %1, %c0_i32 : i32
    %c0_i32_0 = arith.constant 0 : i32
    %c0_i32_1 = arith.constant 0 : i32
    return %2, %c0_i32_0 : i32, i32
  }
  func.func @transform_1(%arg0: i32, %arg1: i32) -> (i32, i32) {
    %c1_i32 = arith.constant 1 : i32
    %0 = arith.muli %arg0, %c1_i32 : i32
    %1 = arith.addi %0, %arg1 : i32
    %c0_i32 = arith.constant 0 : i32
    %2 = arith.minsi %1, %c0_i32 : i32
    %c0_i32_0 = arith.constant 0 : i32
    %c0_i32_1 = arith.constant 0 : i32
    return %2, %c0_i32_0 : i32, i32
  }
  func.func @transform_2(%arg0: i32, %arg1: i32) -> (i32, i32, i32) {
    %c0_i32 = arith.constant 0 : i32
    %c0_i32_0 = arith.constant 0 : i32
    %c0_i32_1 = arith.constant 0 : i32
    return %arg0, %c0_i32, %c0_i32_0 : i32, i32, i32
  }
  func.func @transform_3(%arg0: i32, %arg1: i32) -> (i32, i32, i32) {
    %c0_i32 = arith.constant 0 : i32
    %c0_i32_0 = arith.constant 0 : i32
    %c0_i32_1 = arith.constant 0 : i32
    return %arg0, %c0_i32, %c0_i32_0 : i32, i32, i32
  }
}

</mosaic_0001>

<bundles_post_ra>
// kernel: tpu_custom_call.1
= control target key start
LH: loop header
LB: loop body
LE: loop exit
PB: predicated region body
PF: predicated region fallthrough
CT: control target
= control target key end

     0   :  { %9 = vsyncpa [#allocation3], 0  ;;  %s1074_s0 = inlined_call_operand.hbm [shape: f32[16,128], index: 0, kind: input, shape index: {}]   ;;  %s1075_s1 = inlined_call_operand.hbm [shape: f32[16,128], index: 1, kind: input, shape index: {}]   ;;  %s1076_s2 = inlined_call_operand.hbm [shape: f32[2,8,128], index: 2, kind: output, shape index: {0}]   ;;  %s1077_s3 = inlined_call_operand.hbm [shape: f32[2,8,128], index: 3, kind: output, shape index: {1}]  }
   0x1   :  { %11 = vsyncpa [#allocation3 + $0x1], 0 }
   0x2   :  { %12 = vsyncpa [#allocation6], 0 }
   0x3   :  { %14 = vsyncpa [#allocation6 + $0x1], 0 }
   0x4   :  { %15 = vsyncpa [#allocation4], 0 }
   0x5   :  { %17 = vsyncpa [#allocation4 + $0x1], 0 }
   0x6   :  { %18 = vsyncpa [#allocation9], 0 }
   0x7   :  { %20 = vsyncpa [#allocation9 + $0x1], 0  ;;  %s833_s12 = smov 0   ;;  %s835_s13 = smov 0  }
   0x8   :  { %s837_s14 = smov 0   ;;  %s839_s15 = smov 0  }
   0x9   :  { %s841_s16 = smov 0   ;;  %s843_s17 = smov 0  }
   0xa   :  { %s845_s18 = smov 0   ;;  %s847_s19 = smov 0  }
   0xb LB: > { %s478_s20 = sadd.s32 4294967295, %s804_s19   ;;  %s479_s21 = sadd.s32 4294967294, %s804_s19   ;;  %s804_s19 = sphi %s847_s19, %s26_s19   ;;  %s800_s18 = sphi %s845_s18, %s1096_s18   ;;  %s796_s17 = sphi %s843_s17, %s1095_s17   ;;  %s792_s16 = sphi %s841_s16, %s1064_s16   ;;  %s788_s15 = sphi %s839_s15, %s1094_s15   ;;  %s784_s14 = sphi %s837_s14, %s1093_s14   ;;  %s780_s13 = sphi %s835_s13, %s1092_s13   ;;  %s776_s12 = sphi %s833_s12, %s1091_s12  }
   0xc   : > { %s38_s22 = sadd.s32 1, %s800_s18  ;;  %p773_p1 = scmp.ne.s32.totalorder %s792_s16, 0 }
   0xd   : > { %p40_p0 = scmp.ge.s32.totalorder %s38_s22, 2  ;;  %p59_p2 = scmp.eq.s32.totalorder %s804_s19, 0 }
   0xe   : > { %p64_p3 = scmp.ne.s32.totalorder %s792_s16, %s788_s15  ;;  %p65_p5 = scmp.eq.s32.totalorder %s478_s20, 0 }
   0xf   : > { %s1098_s22 = smov (%p40_p0, %s38_s22), 0  ;;  %p879_p4 = por %p773_p1, %p59_p2 }
  0x10   : > { %p883_p6 = por %p65_p5, %p64_p3  ;;  %s106_s25 = ssub.s32 %s800_s18, %s1098_s22 }
  0x11   : > { %p107_p7 = scmp.eq.s32.totalorder %s106_s25, 0  ;;  %s109_s26 = sadd.s32 1, %s784_s14 }
  0x12   : > { %s1081_s24 = scalar_select %p883_p6, 1, 0 }
  0x13   : > { %s891_s27 = scalar_select %p107_p7, %s784_s14, %s109_s26  }
  0x14   : > { %p119_p8 = scmp.ne.s32.totalorder %s784_s14, %s780_s13  ;;  %p120_p9 = scmp.eq.s32.totalorder %s478_s20, 1 }
  0x15   : > { %p125_p10 = scmp.ne.s32.totalorder %s780_s13, %s776_s12  ;;  %p126_p11 = scmp.eq.s32.totalorder %s479_s21, 1 }
  0x16   : > { %p897_p12 = por %p120_p9, %p119_p8  ;;  %p524_p1 = scmp.lt.s32.totalorder %s804_s19, 2 }
  0x17   : > { %p902_p0 = por %p126_p11, %p125_p10  ;;  %s806_s30 = smov [#allocation2]  }
  0x18   : > { %s1082_s28 = scalar_select %p897_p12, 1, 0 }
  0x19   : > { %s1083_s29 = scalar_select %p902_p0, 1, 0 }
  0x1a   : > { %s186_s4 = sshll.u32 %s806_s30, 4  ;;  %p909_p2 = pnand %p524_p1, %p879_p4  ;;  %s187_s4 = int_to_ptr.vmem [resolvable:$true] %s186_s4 }
  0x1b   : > { %s605_s8 = scalar_lea.hbm %s1074_s0, 256 }
  0x1c   : > { %p606_p3 = scmp.ne.s32.totalorder %s1074_s0, %s605_s8  ;;  %p607_p5 = pneg %p909_p2 }
  0x1d   : > { %p612_p8 = scmp.lt.u32.totalorder %s605_s8, %s605_s8  ;;  %p614_p9 = scmp.lt.u32.totalorder %s605_s8, %s1074_s0 }
  0x1e   : > { %p608_p7 = pnand %p607_p5, %p606_p3 }
  0x1f   : > { %p615_p10 = por %p614_p9, %p612_p8 }
  0x20   : > { %p609_p4 = pneg %p608_p7 }
  0x22   : > { %p616_p11 = pnand %p615_p10, %p609_p4 }
  0x24   : > { %619 = shalt.err (!%p616_p11)
}
  0x25   : > { %s620_s20 = scalar_lea.vmem %s187_s4, 256  ;;  %s627_s21 = scalar_lea.vmem %s187_s4, 512 }
  0x26   : > { %p621_p1 = scmp.ne.s32.totalorder %s187_s4, %s620_s20  ;;  %p628_p12 = scmp.lt.s32.totalorder %s187_s4, %s187_s4 }
  0x27   : > { %p629_p6 = scmp.lt.s32.totalorder %s627_s21, %s620_s20 }
  0x28   : > { %p623_p13 = pnand %p621_p1, %p607_p5 }
  0x29   : > { %p630_p3 = por %p629_p6, %p628_p12 }
  0x2a   : > { %p624_p0 = pneg %p623_p13 }
  0x2c   : > { %p631_p7 = pnand %p630_p3, %p624_p0 }
  0x2e   : > { %634 = shalt.err (!%p631_p7)
}
  0x2f   : > { %s807_s23 = smov 128   ;;  %s808_s25 = smov 8  }
  0x30   : > { %513 = dma.hbm_to_vmem [thread:$0]  (!%p909_p2), %s1074_s0, 256, %s187_s4, [#allocation3], %s807_s23, %s807_s23, %s808_s25  }
  0x31   : > { %p488_p13 = scmp.ge.s32.totalorder %s804_s19, 1  ;;  %p218_p4 = scmp.lt.s32.totalorder %s804_s19, 3 }
  0x32   : > { %s809_s7 = smov [#allocation5]   ;;  %s635_s11 = scalar_lea.hbm %s1075_s1, 256 }
  0x33   : > { %p940_p8 = pnand %p488_p13, %p218_p4  ;;  %s210_s8 = sshll.u32 %s809_s7, 4  ;;  %s211_s8 = int_to_ptr.vmem [resolvable:$true] %s210_s8 }
  0x34   : > { %p636_p6 = scmp.ne.s32.totalorder %s1075_s1, %s635_s11  ;;  %p642_p9 = scmp.lt.u32.totalorder %s635_s11, %s635_s11 }
  0x35   : > { %s1085_s6 = scalar_select %p940_p8, 1, 0 }
  0x36   : > { %p638_p12 = pnand %p636_p6, %p607_p5  ;;  %p644_p10 = scmp.lt.u32.totalorder %s635_s11, %s1075_s1 }
  0x38   : > { %p639_p0 = pneg %p638_p12  ;;  %p645_p11 = por %p644_p10, %p642_p9 }
  0x3a   : > { %p646_p1 = pnand %p645_p11, %p639_p0 }
  0x3c   : > { %649 = shalt.err (!%p646_p1)
}
  0x3d   : > { %s650_s26 = scalar_lea.vmem %s211_s8, 256  ;;  %s657_s30 = scalar_lea.vmem %s211_s8, 512 }
  0x3e   : > { %p651_p3 = scmp.ne.s32.totalorder %s211_s8, %s650_s26  ;;  %p658_p4 = scmp.lt.s32.totalorder %s211_s8, %s211_s8 }
  0x3f   : > { %p659_p8 = scmp.lt.s32.totalorder %s657_s30, %s650_s26 }
  0x40   : > { %p653_p7 = pnand %p651_p3, %p607_p5 }
  0x41   : > { %p660_p6 = por %p659_p8, %p658_p4 }
  0x42   : > { %p654_p13 = pneg %p653_p7 }
  0x44   : > { %p661_p12 = pnand %p660_p6, %p654_p13 }
  0x46   : > { %664 = shalt.err (!%p661_p12)
}
  0x47   : > { %516 = dma.hbm_to_vmem [thread:$0]  (!%p909_p2), %s1075_s1, 256, %s211_s8, [#allocation6], %s807_s23, %s807_s23, %s808_s25  }
  0x48   : > { %p1086_p0 = scmp.ne.s32.totalorder %s1085_s6, 0 }
  0x49   : > { %s224_s10 = sand.u32 (!%p1086_p0), 1, %s792_s16   ;;  %p1087_p5 = scmp.ne.s32.totalorder (!%p1086_p0), %s1081_s24, 0 }
  0x4a   : > { %222 = sbr.rel (%p1086_p0) target bundleno = 160 (0xa0), region = 28  ;;  %s489_s11 = sshll.u32 (!%p1086_p0), %s224_s10, 4 }
  0x4b   : > { %s225_s15 = scalar_lea.sflag (!%p1086_p0), [#allocation3], %s224_s10  ;;  %s228_s20 = scalar_lea.vmem (!%p1086_p0), [#allocation2], %s489_s11 }
  0x51   : > { %758 = dma.done.wait (%p1087_p5), %s225_s15, 256  }
  0x52   : > { %760 = vsyncadd (%p1087_p5), %s225_s15, 4294967040  ;;  %s234_s5 = scalar_lea.sflag [#allocation6], %s224_s10  ;;  %s237_s4 = scalar_lea.vmem [#allocation5], %s489_s11 }
  0x53   : > { %762 = dma.done.wait (%p1087_p5), %s234_s5, 256  }
  0x54   : > { %764 = vsyncadd (%p1087_p5), %s234_s5, 4294967040  ;;  %s979_s23 = sand.u32 1, %s780_s13   ;;  %v810_v0 = vmov 0.0   ;;  %p493_p2 = scmp.ge.s32.totalorder %s796_s17, 1 }
  0x55   : > { %s491_s25 = sshll.u32 %s979_s23, 3  ;;  %v289_v1 = vld [vmem:[%s228_s20] sm:$0xff] (!%p493_p2)  ;;  %v290_v2 = vld [vmem:[%s228_s20 + $0x8] sm:$0xff] (!%p493_p2) }
  0x56   : > { %s982_s6 = scalar_lea.vmem [#allocation7], %s491_s25  ;;  %s985_s8 = scalar_lea.vmem [#allocation8], %s491_s25  ;;  %v293_v3 = vmul.f32 (!%p493_p2), 0.5, %v289_v1  ;;  %v294_v4 = vmul.f32 (!%p493_p2), 0.5, %v290_v2  ;;  %v291_v8 = vld [vmem:[%s237_s4] sm:$0xff] (!%p493_p2)  ;;  %v292_v10 = vld [vmem:[%s237_s4 + $0x8] sm:$0xff] (!%p493_p2) }
  0x57   : > { %283 = vst [vmem:[%s982_s6] sm:$0xff] %v810_v0  ;;  %284 = vst [vmem:[%s985_s8] sm:$0xff] %v810_v0  ;;  %288 = sbr.rel (%p493_p2) target bundleno = 111 (0x6f), region = 44 }
  0x58   : > { %601 = vtanh.f32 (!%p493_p2), %v293_v3 }
  0x59   : > { %603 = vtanh.f32 (!%p493_p2), %v294_v4 }
  0x5e   : > { %v301_v17 = vld [vmem:[%s982_s6] sm:$0xff]  ;;  %v307_v18 = vld [vmem:[%s985_s8] sm:$0xff] }
  0x62   : > { %v602_v5 = vpop.eup %601 }
  0x63   : > { %v604_v6 = vpop.eup %603  ;;  %v297_v7 = vadd.f32 1.0, %v602_v5 }
  0x64   : > { %v298_v9 = vadd.f32 1.0, %v604_v6 }
  0x65   : > { %v299_v11 = vmul.f32 0.5, %v297_v7 }
  0x66   : > { %v300_v12 = vmul.f32 0.5, %v298_v9 }
  0x67   : > { %v302_v13 = vmul.f32 %v299_v11, %v291_v8  ;;  %v308_v14 = vadd.f32 %v299_v11, %v291_v8 }
  0x68   : > { %v303_v15 = vmul.f32 %v300_v12, %v292_v10  ;;  %v309_v16 = vadd.f32 %v300_v12, %v292_v10 }
  0x6a   : > { %v304_v19 = vadd.f32 %v303_v15, %v302_v13  ;;  %v310_v20 = vadd.f32 %v309_v16, %v308_v14 }
  0x6c   : > { %v305_v21 = vadd.f32 %v304_v19, %v301_v17  ;;  %v311_v22 = vadd.f32 %v310_v20, %v307_v18 }
  0x6e   : > { %306 = vst [vmem:[%s982_s6] sm:$0xff] %v305_v21  ;;  %312 = vst [vmem:[%s985_s8] sm:$0xff] %v311_v22 }
  0x6f PF: > { %s496_s24 = sshll.u32 %s796_s17, 7  ;;  %s332_s7 = sshll.u32 %s982_s6, 4  ;;  %s333_s7 = int_to_ptr.vmem [resolvable:$true] %s332_s7 }
  0x70   : > { %s999_s30 = scalar_lea.hbm %s1076_s2, %s496_s24  ;;  %s314_s9 = scalar_lea.sflag [#allocation4], %s979_s23 }
  0x71   : > { %s665_s10 = scalar_lea.vmem %s333_s7, 128  ;;  %p1088_p9 = scmp.ne.s32.totalorder %s1082_s28, 0 }
  0x72   : > { %p666_p8 = scmp.ne.s32.totalorder %s333_s7, %s665_s10  ;;  %s811_s11 = smov [#allocation7]  }
  0x73   : > { %s669_s15 = sshll.u32 %s811_s11, 4  ;;  %s670_s15 = int_to_ptr.vmem [resolvable:$false] %s669_s15 }
  0x74   : > { %p667_p10 = pnand %p666_p8, %p1088_p9  ;;  %s671_s20 = scalar_lea.vmem %s670_s15, 256 }
  0x75   : > { %p672_p1 = scmp.lt.s32.totalorder %s333_s7, %s670_s15  ;;  %p673_p3 = scmp.lt.s32.totalorder %s671_s20, %s665_s10 }
  0x76   : > { %p668_p11 = pneg %p667_p10 }
  0x77   : > { %p674_p7 = por %p673_p3, %p672_p1 }
  0x79   : > { %p675_p13 = pnand %p674_p7, %p668_p11 }
  0x7b   : > { %678 = shalt.err (!%p675_p13)
}
  0x7c   : > { %s679_s5 = scalar_lea.hbm %s999_s30, 128  ;;  %s683_s6 = scalar_lea.hbm %s1076_s2, 256 }
  0x7d   : > { %p680_p4 = scmp.ne.s32.totalorder %s999_s30, %s679_s5  ;;  %p684_p0 = scmp.lt.u32.totalorder %s999_s30, %s1076_s2 }
  0x7e   : > { %p685_p5 = scmp.lt.u32.totalorder %s683_s6, %s679_s5  ;;  %p687_p8 = scmp.lt.u32.totalorder %s679_s5, %s999_s30 }
  0x7f   : > { %p681_p6 = pnand %p680_p4, %p1088_p9 }
  0x80   : > { %p686_p2 = por %p685_p5, %p684_p0 }
  0x81   : > { %p682_p12 = pneg %p681_p6 }
  0x82   : > { %p688_p10 = por %p687_p8, %p686_p2 }
  0x84   : > { %p689_p11 = pnand %p688_p10, %p682_p12 }
  0x86   : > { %692 = shalt.err (!%p689_p11)
}
  0x87   : > { %506 = dma.vmem_to_hbm [thread:$0]  (%p1088_p9), %s333_s7, 128, %s999_s30, %s314_s9  }
  0x88   : > { %s1025_s15 = scalar_lea.hbm %s1077_s3, %s496_s24  ;;  %s345_s20 = sshll.u32 %s985_s8, 4  ;;  %s346_s20 = int_to_ptr.vmem [resolvable:$true] %s345_s20 }
  0x89   : > { %s319_s5 = scalar_lea.sflag [#allocation9], %s979_s23  ;;  %s693_s4 = scalar_lea.vmem %s346_s20, 128 }
  0x8a   : > { %p694_p1 = scmp.ne.s32.totalorder %s346_s20, %s693_s4  ;;  %s812_s25 = smov [#allocation8]  }
  0x8b   : > { %s697_s6 = sshll.u32 %s812_s25, 4  ;;  %s698_s6 = int_to_ptr.vmem [resolvable:$false] %s697_s6 }
  0x8c   : > { %p695_p3 = pnand %p694_p1, %p1088_p9  ;;  %s699_s21 = scalar_lea.vmem %s698_s6, 256 }
  0x8d   : > { %p700_p13 = scmp.lt.s32.totalorder %s346_s20, %s698_s6  ;;  %p701_p4 = scmp.lt.s32.totalorder %s699_s21, %s693_s4 }
  0x8e   : > { %p696_p7 = pneg %p695_p3 }
  0x8f   : > { %p702_p6 = por %p701_p4, %p700_p13 }
  0x91   : > { %p703_p12 = pnand %p702_p6, %p696_p7 }
  0x93   : > { %706 = shalt.err (!%p703_p12)
}
  0x94   : > { %s707_s17 = scalar_lea.hbm %s1025_s15, 128  ;;  %s711_s24 = scalar_lea.hbm %s1077_s3, 256 }
  0x95   : > { %p708_p0 = scmp.ne.s32.totalorder %s1025_s15, %s707_s17  ;;  %p712_p8 = scmp.lt.u32.totalorder %s1025_s15, %s1077_s3 }
  0x96   : > { %p713_p10 = scmp.lt.u32.totalorder %s711_s24, %s707_s17  ;;  %p715_p1 = scmp.lt.u32.totalorder %s707_s17, %s1025_s15 }
  0x97   : > { %p709_p5 = pnand %p708_p0, %p1088_p9 }
  0x98   : > { %p714_p11 = por %p713_p10, %p712_p8 }
  0x99   : > { %p710_p2 = pneg %p709_p5 }
  0x9a   : > { %p716_p3 = por %p715_p1, %p714_p11 }
  0x9c   : > { %p717_p7 = pnand %p716_p3, %p710_p2 }
  0x9e   : > { %720 = shalt.err (!%p717_p7)
}
  0x9f   : > { %507 = dma.vmem_to_hbm [thread:$0]  (%p1088_p9), %s346_s20, 128, %s1025_s15, %s319_s5  }
  0xa0 PF: > { %s357_s9 = sand.u32 1, %s776_s12   ;;  %p1089_p13 = scmp.ne.s32.totalorder %s1083_s29, 0 }
  0xa1   : > { %p1090_p4 = scmp.ge.s32.totalorder %s804_s19, 2  ;;  %s358_s26 = scalar_lea.sflag [#allocation4], %s357_s9 }
  0xa3   : > { %p518_p6 = pnand %p1090_p4, %p1089_p13 }
  0xa5   : > { %766 = dma.done.wait (!%p518_p6), %s358_s26, 128  }
  0xa6   : > { %768 = vsyncadd (!%p518_p6), %s358_s26, 4294967168  ;;  %s367_s10 = scalar_lea.sflag [#allocation9], %s357_s9 }
  0xa7   : > { %770 = dma.done.wait (!%p518_p6), %s367_s10, 128  }
  0xa8   : > { %772 = vsyncadd (!%p518_p6), %s367_s10, 4294967168  ;;  %s26_s19 = sadd.s32 1, %s804_s19   ;;  %s1091_s12 = smov %s780_s13 }
  0xa9   : > { %p23_p12 = scmp.ge.s32.totalorder %s26_s19, 4   ;;  %s1092_s13 = smov %s784_s14 }
  0xaa   : > { %s1093_s14 = smov %s891_s27  ;;  %s1094_s15 = smov %s792_s16 }
  0xab   : > { %s1064_s16 = smov 0   ;;  %s1095_s17 = smov %s800_s18 }
  0xac   : > { %s1096_s18 = smov %s1098_s22  ;;  %25 = sbr.rel (!%p23_p12) target bundleno = 11 (0xb), region = 111 }
  0xb3   :  { %372 = vsyncpa [#allocation3], 1 }
  0xb4   :  { %374 = vsyncpa [#allocation3 + $0x1], 1 }
  0xb5   :  { %375 = vsyncpa [#allocation6], 1 }
  0xb6   :  { %377 = vsyncpa [#allocation6 + $0x1], 1 }
  0xb7   :  { %378 = vsyncpa [#allocation4], 1 }
  0xb8   :  { %380 = vsyncpa [#allocation4 + $0x1], 1 }
  0xb9   :  { %381 = vsyncpa [#allocation9], 1 }
  0xba   :  { %383 = vsyncpa [#allocation9 + $0x1], 1 }

</bundles_post_ra>
